<compile_context>
chip_gen: v5e
topology: v5e:2x2
jax: 0.10.0
libtpu: 0.0.40
codegen_flags: <defaults>
</compile_context>

<pallas_src>
import functools

import jax
import jax.numpy as jnp
from jax.experimental import pallas as pl
from jax.experimental.pallas import tpu as pltpu


def _softplus(x):
    # Numerically stable softplus.  (log1p would add < 1e-7 absolute accuracy at
    # large |x|; plain log keeps the lowering on proven primitives.)
    return jnp.maximum(x, 0.0) + jnp.log(1.0 + jnp.exp(-jnp.abs(x)))


# ---------------------------------------------------------------------------
# Kernel 1: type-attention softmax, padded (A - I) and its (T+1)-th power.
# Batch independent; all heads handled in one grid step (no per-head grid
# overhead, one head-stacked projection matmul).
# ---------------------------------------------------------------------------
def _type_attn_kernel(q_ref, k_ref, wq_ref, wk_ref, a0_ref, apow_ref, *,
                      n_head, d_k, num_types, num_taylor_terms):
    f32 = jnp.float32
    qh_all = jnp.dot(q_ref[...], wq_ref[...], preferred_element_type=f32)  # (nt, H*dk)
    kh_all = jnp.dot(k_ref[...], wk_ref[...], preferred_element_type=f32)

    row = jax.lax.broadcasted_iota(jnp.int32, (num_types, num_types), 0)
    col = jax.lax.broadcasted_iota(jnp.int32, (num_types, num_types), 1)
    eye = (row == col).astype(f32)
    non_pad = jnp.logical_and(row > 0, col > 0).astype(f32)
    scale = 1.0 / (d_k ** 0.5)

    for h in range(n_head):                               # small, static -> unrolled
        qh = qh_all[:, h * d_k:(h + 1) * d_k]
        kh = kh_all[:, h * d_k:(h + 1) * d_k]
        scores = jax.lax.dot_general(
            qh, kh, (((1,), (1,)), ((), ())), preferred_element_type=f32) * scale
        # pad type excluded from the softmax (reference slices it off before attn)
        scores = jnp.where(col > 0, scores, -1e30)
        m = jnp.max(scores, axis=-1, keepdims=True)
        e = jnp.exp(scores - m)
        attn = e / jnp.sum(e, axis=-1, keepdims=True)     # exact recip: feeds A^(T+1)
        a0 = (attn - eye) * non_pad                       # padded (A - I), zero pad row/col
        a0_ref[h] = a0

        ap = a0                                           # (A - I)^(T+1) -> returned attn_
        for _ in range(num_taylor_terms):
            ap = jnp.dot(ap, a0, preferred_element_type=f32)
        apow_ref[h] = ap


# ---------------------------------------------------------------------------
# Kernel P: per-batch, strip-tiled projections  v @ Wv, gh_1(z), gh_decay(z).
# Keeps full z / v out of kernel 2's VMEM budget.
# ---------------------------------------------------------------------------
def _proj_kernel(z_ref, v_ref, wv_ref, ghw_ref, gdw_ref, vp_ref, pg_ref, pd_ref):
    f32 = jnp.float32
    z = z_ref[0]                                          # (tile_l, d_model)
    v = v_ref[0]
    vp_ref[0] = jnp.dot(v, wv_ref[...], preferred_element_type=f32)
    pg_ref[0] = jnp.dot(z, ghw_ref[...], preferred_element_type=f32)
    pd_ref[0] = jnp.dot(z, gdw_ref[...], preferred_element_type=f32)


# ---------------------------------------------------------------------------
# Kernel 2: heat-diffusion update, strip-tiled over len_v, heads fused in-kernel.
# ---------------------------------------------------------------------------
def _hda_diffusion_kernel(gh1b_ref, gdb_ref, a0_ref, y_ref, ys_ref,
                          vp_ref, vps_ref, pg_ref, pgs_ref, pd_ref, pds_ref,
                          out_ref, obuf_ref, *,
                          n_head, d_v, num_taylor_terms, matmul_dtype):
    f32 = jnp.float32
    md = matmul_dtype

    y_full = y_ref[0]                        # (len_v, num_types)
    y_strip = ys_ref[0]                      # (tile_l, num_types)
    vp_full = vp_ref[0]                      # (len_v, n_head*d_v)
    vp_strip = vps_ref[0]                    # (tile_l, n_head*d_v)
    pg_rows = pgs_ref[0]                     # (tile_l, n_head)
    pd_rows = pds_ref[0]
    # One tiny (len_v, n_head) -> (n_head, len_v) transpose per strip; the rank-1
    # trick means no (L, L, d_model) pairwise-difference tensor is ever built.
    pg_cols = pg_ref[0].T                    # (n_head, len_v)
    pd_cols = pd_ref[0].T

    y_full_m = y_full.astype(md)
    y_strip_m = y_strip.astype(md)

    inv_fact = [1.0]                         # 1 / t!
    for t in range(1, num_taylor_terms):
        inv_fact.append(inv_fact[-1] / t)

    nt_dims = (((1,), (1,)), ((), ()))       # contract last dims ("NT" matmul)

    for h in range(n_head):                  # small, static -> unrolled
        a0_m = a0_ref[h].astype(md)          # (nt, nt)  padded (A - I)
        bg = gh1b_ref[h]                     # SMEM scalars
        bd = gdb_ref[h]

        # Gh[i,j] = softplus(<z_i - z_j, w_h> + b_h)   (rank-1 outer difference)
        gh = _softplus(pg_rows[:, h:h + 1] - pg_cols[h:h + 1, :] + bg)   # (tile_l, len_v)
        # exp(-softplus(x)) == sigmoid(-x): one exp + one approx reciprocal (EUP).
        decay = pl.reciprocal(
            1.0 + jnp.exp(pd_rows[:, h:h + 1] - pd_cols[h:h + 1, :] + bd),
            approx=True)

        # Taylor series: sum_t (y A^{t+1} y^T) * Gh^{t+1} / t!
        b_t = jnp.dot(y_strip_m, a0_m, preferred_element_type=f32)       # (tile_l, nt)
        gh_pow = gh
        t_acc = jnp.zeros_like(gh)
        for t in range(num_taylor_terms):    # small, static
            e_t = jax.lax.dot_general(b_t.astype(md), y_full_m, nt_dims,
                                      preferred_element_type=f32)        # (tile_l, len_v)
            t_acc = t_acc + e_t * (gh_pow * inv_fact[t])
            if t + 1 < num_taylor_terms:
                gh_pow = gh_pow * gh
                b_t = jnp.dot(b_t.astype(md), a0_m, preferred_element_type=f32)

        t_acc = t_acc * decay                # decaying=True
        # TODO(synk): optional `mask` (masked_fill_) path unused; forward uses mask=None.

        vp_h = vp_full[:, h * d_v:(h + 1) * d_v].astype(md)              # (len_v, d_v)
        out_h = jnp.dot(t_acc.astype(md), vp_h, preferred_element_type=f32)
        obuf_ref[:, h * d_v:(h + 1) * d_v] = (
            out_h + vp_strip[:, h * d_v:(h + 1) * d_v])

    out_ref[0] = obuf_ref[...]               # single contiguous store per strip
    # NOTE: if n_head*d_v < 128 this store is lane-masked; pad the last dim to a
    # multiple of 128 in out_shape (and strip in the wrapper) for store-bound cases.


# ---------------------------------------------------------------------------
# Wrapper
# ---------------------------------------------------------------------------
def _vmem_limit_bytes():
    """Generation-aware VMEM cap: ~3/4 of physical, with a safe 48 MiB fallback."""
    try:
        info = pltpu.get_tpu_info()
        cap = int(getattr(info, "vmem_capacity_bytes"))
        if cap > 0:
            return int(min(max(cap * 3 // 4, 32 * 1024 * 1024), 100 * 1024 * 1024))
    except Exception:
        pass
    return 48 * 1024 * 1024  # fits every generation (v7x physical VMEM is 64 MiB)


def _choose_tile_l(len_v, vmem_limit_bytes):
    """Largest multiple-of-8 divisor of len_v whose (tile, len_v) temps fit VMEM."""
    if len_v <= 256:
        return len_v
    budget = vmem_limit_bytes // 3               # headroom for pipelined blocks
    cap = max(8, budget // (6 * 4 * len_v))      # ~6 live f32 (tile, len_v) temporaries
    cap = min(cap, len_v, 512)
    best = None
    t = 8
    while t <= cap:
        if len_v % t == 0:
            best = t
        t += 8
    return best if best is not None else len_v


def heat_diffusion_attention(q, k, v, z, y, params, *, n_head, d_k, d_v,
                             num_taylor_terms, matmul_dtype=jnp.bfloat16):
    num_types, d_model = q.shape
    b, len_v, _ = v.shape
    hdv = n_head * d_v
    f32 = jnp.float32

    wq = params["w_qs"]                      # (d_model, H*d_k)
    wk = params["w_ks"]
    wv = params["w_vs"]                      # (d_model, H*d_v)
    ghw = params["gh_1_w"].T                 # (d_model, H)
    gdw = params["gh_decay_w"].T
    gh1_b = params["gh_1_b"]                 # (H,)
    gd_b = params["gh_decay_b"]

    vmem_limit = _vmem_limit_bytes()
    tile_l = _choose_tile_l(len_v, vmem_limit)
    num_strips = len_v // tile_l

    # ---- kernel 1: type attention + padded (A - I) + its (T+1)-th power --------
    attn_kern = functools.partial(_type_attn_kernel, n_head=n_head, d_k=d_k,
                                  num_types=num_types,
                                  num_taylor_terms=num_taylor_terms)
    a0_all, attn_pow = pl.pallas_call(
        attn_kern,
        out_shape=(jax.ShapeDtypeStruct((n_head, num_types, num_types), f32),
                   jax.ShapeDtypeStruct((n_head, num_types, num_types), f32)),
        grid_spec=pltpu.PrefetchScalarGridSpec(
            num_scalar_prefetch=0, grid=(1,),
            in_specs=[pl.BlockSpec((num_types, d_model), lambda i: (0, 0)),
                      pl.BlockSpec((num_types, d_model), lambda i: (0, 0)),
                      pl.BlockSpec((d_model, n_head * d_k), lambda i: (0, 0)),
                      pl.BlockSpec((d_model, n_head * d_k), lambda i: (0, 0))],
            out_specs=[pl.BlockSpec((n_head, num_types, num_types),
                                    lambda i: (0, 0, 0)),
                       pl.BlockSpec((n_head, num_types, num_types),
                                    lambda i: (0, 0, 0))]),
        compiler_params=pltpu.CompilerParams(dimension_semantics=("arbitrary",)),
    )(q, k, wq, wk)

    # ---- kernel P: per-batch strip-tiled projections ---------------------------
    vp_all, pg_all, pd_all = pl.pallas_call(
        _proj_kernel,
        out_shape=(jax.ShapeDtypeStruct((b, len_v, hdv), f32),
                   jax.ShapeDtypeStruct((b, len_v, n_head), f32),
                   jax.ShapeDtypeStruct((b, len_v, n_head), f32)),
        grid_spec=pltpu.PrefetchScalarGridSpec(
            num_scalar_prefetch=0, grid=(b, num_strips),
            in_specs=[pl.BlockSpec((1, tile_l, d_model), lambda bi, li: (bi, li, 0)),
                      pl.BlockSpec((1, tile_l, d_model), lambda bi, li: (bi, li, 0)),
                      pl.BlockSpec((d_model, hdv), lambda bi, li: (0, 0)),
                      pl.BlockSpec((d_model, n_head), lambda bi, li: (0, 0)),
                      pl.BlockSpec((d_model, n_head), lambda bi, li: (0, 0))],
            out_specs=[pl.BlockSpec((1, tile_l, hdv), lambda bi, li: (bi, li, 0)),
                       pl.BlockSpec((1, tile_l, n_head), lambda bi, li: (bi, li, 0)),
                       pl.BlockSpec((1, tile_l, n_head), lambda bi, li: (bi, li, 0))]),
        compiler_params=pltpu.CompilerParams(
            dimension_semantics=("parallel", "parallel"),
            vmem_limit_bytes=vmem_limit),
    )(z, v, wv, ghw, gdw)

    # ---- kernel 2: strip-tiled diffusion update --------------------------------
    diff_kern = functools.partial(
        _hda_diffusion_kernel, n_head=n_head, d_v=d_v,
        num_taylor_terms=num_taylor_terms, matmul_dtype=matmul_dtype)
    smem_spec = pl.BlockSpec(memory_space=pltpu.MemorySpace.SMEM)

    def per_batch(shp):
        return pl.BlockSpec(shp, lambda bi, li: (bi, 0, 0))

    def per_strip(shp):
        return pl.BlockSpec(shp, lambda bi, li: (bi, li, 0))

    output = pl.pallas_call(
        diff_kern,
        out_shape=jax.ShapeDtypeStruct((b, len_v, hdv), f32),
        grid_spec=pltpu.PrefetchScalarGridSpec(
            num_scalar_prefetch=0, grid=(b, num_strips),
            in_specs=[
                smem_spec,                                                # gh_1 bias
                smem_spec,                                                # gh_decay bias
                pl.BlockSpec((n_head, num_types, num_types),
                             lambda bi, li: (0, 0, 0)),                   # padded A - I
                per_batch((1, len_v, num_types)),                         # y (all rows)
                per_strip((1, tile_l, num_types)),                        # y (strip rows)
                per_batch((1, len_v, hdv)),                               # v proj (all)
                per_strip((1, tile_l, hdv)),                              # v proj (strip)
                per_batch((1, len_v, n_head)),                            # gh_1(z) (all)
                per_strip((1, tile_l, n_head)),                           # gh_1(z) (strip)
                per_batch((1, len_v, n_head)),                            # gh_decay(z) (all)
                per_strip((1, tile_l, n_head)),                           # gh_decay(z) (strip)
            ],
            out_specs=per_strip((1, tile_l, hdv)),
            scratch_shapes=[pltpu.VMEM((tile_l, hdv), f32)]),
        compiler_params=pltpu.CompilerParams(
            dimension_semantics=("parallel", "parallel"),
            vmem_limit_bytes=vmem_limit),
    )(gh1_b, gd_b, a0_all, y, y, vp_all, vp_all, pg_all, pg_all, pd_all, pd_all)

    # dropout (eval) / layer_norm=Identity / residual=False are no-ops.
    event_emb = q                                # residual_q
    return output, attn_pow, event_emb


# ---------------------------------------------------------------------------
# Pure-JAX reference of the PyTorch forward (eval mode) for verification.
# ---------------------------------------------------------------------------
def _reference_forward(q, k, v, z, y, params, *, n_head, d_k, d_v, num_taylor_terms):
    num_types, _ = q.shape
    b, len_v, _ = v.shape
    len_q = num_types - 1

    q2, k2 = q[1:], k[1:]
    qh = (q2 @ params["w_qs"]).reshape(len_q, n_head, d_k).transpose(1, 0, 2)
    kh = (k2 @ params["w_ks"]).reshape(len_q, n_head, d_k).transpose(1, 0, 2)
    vh = (v @ params["w_vs"]).reshape(b, len_v, n_head, d_v).transpose(0, 2, 1, 3)

    scores = jnp.einsum("hqd,hkd->hqk", qh, kh) / (d_k ** 0.5)
    attn = jax.nn.softmax(scores, axis=-1)
    attn = attn - jnp.eye(len_q, dtype=attn.dtype)[None]
    attn = jnp.pad(attn, ((0, 0), (1, 0), (1, 0)))

    zdiff = z[:, :, None, :] - z[:, None, :, :]
    Gh = jax.nn.softplus(jnp.einsum("bijd,hd->bijh", zdiff, params["gh_1_w"])
                         + params["gh_1_b"]).transpose(0, 3, 1, 2)

    hks, ghs = [], []
    attn_p, gh_p = attn, Gh
    for _ in range(num_taylor_terms):
        hks.append(attn_p)
        ghs.append(gh_p)
        gh_p = gh_p * Gh
        attn_p = jnp.einsum("hqk,hkl->hql", attn_p, attn)
    hks = jnp.stack(hks, axis=1)
    hks = jnp.einsum("htqk,bvq->bhtvk", hks, y)
    hks = jnp.einsum("bhtvk,bok->bhtvo", hks, y)
    ft = [1.0]
    for i in range(num_taylor_terms - 1):
        ft.append(ft[-1] * (i + 1))
    ghs = jnp.stack(ghs, axis=2) / jnp.asarray(ft)[None, None, :, None, None]
    T = jnp.einsum("bhtvo,bhtvo->bhvo", hks, ghs)

    decay = jax.nn.softplus(jnp.einsum("bijd,hd->bijh", zdiff, params["gh_decay_w"])
                            + params["gh_decay_b"]).transpose(0, 3, 1, 2)
    T = T * jnp.exp(-decay)

    output = jnp.einsum("bhvo,bhod->bhvd", T, vh) + vh
    output = output.transpose(0, 2, 1, 3).reshape(b, len_v, n_head * d_v)
    return output, attn_p, q


def init_params(key, d_model, n_head, d_k, d_v):
    ks = jax.random.split(key, 8)

    def xavier(kk, shape, fan_in, fan_out):
        limit = (6.0 / (fan_in + fan_out)) ** 0.5
        return jax.random.uniform(kk, shape, jnp.float32, -limit, limit)

    return {
        # stored transposed vs. torch (so projection is x @ W)
        "w_qs": xavier(ks[0], (d_model, n_head * d_k), d_model, n_head * d_k),
        "w_ks": xavier(ks[1], (d_model, n_head * d_k), d_model, n_head * d_k),
        "w_vs": xavier(ks[2], (d_model, n_head * d_v), d_model, n_head * d_v),
        "gh_1_w": xavier(ks[3], (n_head, d_model), d_model, n_head),
        "gh_1_b": 0.05 * jax.random.normal(ks[4], (n_head,), jnp.float32),
        "gh_decay_w": xavier(ks[5], (n_head, d_model), d_model, n_head),
        "gh_decay_b": 0.05 * jax.random.normal(ks[6], (n_head,), jnp.float32),
    }


if __name__ == "__main__":
    n_head, d_model, d_k, d_v = 4, 32, 8, 8
    num_taylor_terms = 3
    b, len_v, num_types = 2, 8, 9

    key = jax.random.PRNGKey(0)
    kq, kk, kv_, kz, kt, kp = jax.random.split(key, 6)
    q = jax.random.normal(kq, (num_types, d_model), jnp.float32)
    k = jax.random.normal(kk, (num_types, d_model), jnp.float32)
    v = jax.random.normal(kv_, (b, len_v, d_model), jnp.float32)
    z = jax.random.normal(kz, (b, len_v, d_model), jnp.float32)
    types = jax.random.randint(kt, (b, len_v), 0, num_types)
    y = jax.nn.one_hot(types, num_types, dtype=jnp.float32)

    params = init_params(kp, d_model, n_head, d_k, d_v)

    out, attn_, event_emb = heat_diffusion_attention(
        q, k, v, z, y, params,
        n_head=n_head, d_k=d_k, d_v=d_v, num_taylor_terms=num_taylor_terms)
    jax.block_until_ready((out, attn_, event_emb))

    assert out.shape == (b, len_v, n_head * d_v)
    assert attn_.shape == (n_head, num_types, num_types)
    assert event_emb.shape == (num_types, d_model)

    # Verify against a pure-JAX port of the PyTorch forward (bf16-matmul tolerance).
    ref_out, ref_attn, _ = _reference_forward(
        q, k, v, z, y, params,
        n_head=n_head, d_k=d_k, d_v=d_v, num_taylor_terms=num_taylor_terms)
    out_scale = float(jnp.max(jnp.abs(ref_out)))
    attn_scale = float(jnp.max(jnp.abs(ref_attn)))
    out_err = float(jnp.max(jnp.abs(out - ref_out)))
    attn_err = float(jnp.max(jnp.abs(attn_ - ref_attn)))
    assert out_err <= 5e-2 * (1.0 + out_scale), ("output mismatch", out_err, out_scale)
    assert attn_err <= 2e-2 * (1.0 + attn_scale), ("attn mismatch", attn_err, attn_scale)

    print("KERNEL_OK")
</pallas_src>

<mosaic_0001>
module attributes {stable_mosaic.version = 11 : i64} {
  func.func @_type_attn_kernel(%arg0: i32, %arg1: memref<9x32xf32, #tpu.memory_space<vmem>>, %arg2: memref<9x32xf32, #tpu.memory_space<vmem>>, %arg3: memref<32x32xf32, #tpu.memory_space<vmem>>, %arg4: memref<32x32xf32, #tpu.memory_space<vmem>>, %arg5: memref<4x9x9xf32, #tpu.memory_space<vmem>>, %arg6: memref<4x9x9xf32, #tpu.memory_space<vmem>>) attributes {dimension_semantics = [#tpu.dimension_semantics<arbitrary>], iteration_bounds = array<i64: 1>, scalar_prefetch = 0 : i64, scratch_operands = 0 : i64, tpu.core_type = #tpu.core_type<tc>, window_params = [{pipeline_mode = #tpu.pipeline_mode<synchronous>, transform_indices = @transform_0, window_bounds = array<i64: 9, 32>}, {pipeline_mode = #tpu.pipeline_mode<synchronous>, transform_indices = @transform_1, window_bounds = array<i64: 9, 32>}, {pipeline_mode = #tpu.pipeline_mode<synchronous>, transform_indices = @transform_2, window_bounds = array<i64: 32, 32>}, {pipeline_mode = #tpu.pipeline_mode<synchronous>, transform_indices = @transform_3, window_bounds = array<i64: 32, 32>}, {pipeline_mode = #tpu.pipeline_mode<synchronous>, transform_indices = @transform_4, window_bounds = array<i64: 4, 9, 9>}, {pipeline_mode = #tpu.pipeline_mode<synchronous>, transform_indices = @transform_5, window_bounds = array<i64: 4, 9, 9>}]} {
    %c0 = arith.constant 0 : index
    %c0_0 = arith.constant 0 : index
    %0 = vector.load %arg1[%c0, %c0_0] : memref<9x32xf32, #tpu.memory_space<vmem>>, vector<9x32xf32>
    %c0_1 = arith.constant 0 : index
    %c0_2 = arith.constant 0 : index
    %1 = vector.load %arg3[%c0_1, %c0_2] : memref<32x32xf32, #tpu.memory_space<vmem>>, vector<32x32xf32>
    %cst = arith.constant dense<0.000000e+00> : vector<9x32xf32>
    %2 = tpu.matmul %0, %1, %cst {dimension_numbers = #tpu.dot_dimension_numbers<[1], [0], [0], [1], [0, 0, 1, 1], [], []>} : vector<9x32xf32>, vector<32x32xf32>, vector<9x32xf32> -> vector<9x32xf32>
    %c0_3 = arith.constant 0 : index
    %c0_4 = arith.constant 0 : index
    %3 = vector.load %arg2[%c0_3, %c0_4] : memref<9x32xf32, #tpu.memory_space<vmem>>, vector<9x32xf32>
    %c0_5 = arith.constant 0 : index
    %c0_6 = arith.constant 0 : index
    %4 = vector.load %arg4[%c0_5, %c0_6] : memref<32x32xf32, #tpu.memory_space<vmem>>, vector<32x32xf32>
    %cst_7 = arith.constant dense<0.000000e+00> : vector<9x32xf32>
    %5 = tpu.matmul %3, %4, %cst_7 {dimension_numbers = #tpu.dot_dimension_numbers<[1], [0], [0], [1], [0, 0, 1, 1], [], []>} : vector<9x32xf32>, vector<32x32xf32>, vector<9x32xf32> -> vector<9x32xf32>
    %6 = tpu.iota {dimensions = array<i32: 0>} : vector<9x9xi32>
    %7 = tpu.iota {dimensions = array<i32: 1>} : vector<9x9xi32>
    %8 = arith.cmpi eq, %6, %7 : vector<9x9xi32>
    %9 = arith.extui %8 : vector<9x9xi1> to vector<9x9xi32>
    %10 = arith.sitofp %9 : vector<9x9xi32> to vector<9x9xf32>
    %c0_i32 = arith.constant 0 : i32
    %11 = vector.broadcast %c0_i32 : i32 to vector<9x9xi32>
    %12 = arith.cmpi sgt, %6, %11 : vector<9x9xi32>
    %c0_i32_8 = arith.constant 0 : i32
    %13 = vector.broadcast %c0_i32_8 : i32 to vector<9x9xi32>
    %14 = arith.cmpi sgt, %7, %13 : vector<9x9xi32>
    %15 = arith.andi %12, %14 : vector<9x9xi1>
    %16 = arith.extui %15 : vector<9x9xi1> to vector<9x9xi32>
    %17 = arith.sitofp %16 : vector<9x9xi32> to vector<9x9xf32>
    %18 = vector.extract_strided_slice %2 {offsets = [0, 0], sizes = [9, 8], strides = [1, 1]} : vector<9x32xf32> to vector<9x8xf32>
    %19 = vector.extract_strided_slice %5 {offsets = [0, 0], sizes = [9, 8], strides = [1, 1]} : vector<9x32xf32> to vector<9x8xf32>
    %cst_9 = arith.constant dense<0.000000e+00> : vector<9x9xf32>
    %20 = tpu.matmul %18, %19, %cst_9 {dimension_numbers = #tpu.dot_dimension_numbers<[1], [1], [0], [0], [0, 0, 1, 0], [], []>} : vector<9x8xf32>, vector<9x8xf32>, vector<9x9xf32> -> vector<9x9xf32>
    %cst_10 = arith.constant 0.353553385 : f32
    %21 = vector.broadcast %cst_10 : f32 to vector<9x9xf32>
    %22 = arith.mulf %20, %21 : vector<9x9xf32>
    %c0_i32_11 = arith.constant 0 : i32
    %23 = vector.broadcast %c0_i32_11 : i32 to vector<9x9xi32>
    %24 = arith.cmpi sgt, %7, %23 : vector<9x9xi32>
    %cst_12 = arith.constant -1.000000e+30 : f32
    %25 = vector.broadcast %cst_12 : f32 to vector<9x9xf32>
    %26 = arith.select %24, %22, %25 : vector<9x9xi1>, vector<9x9xf32>
    %cst_13 = arith.constant dense<0xFF800000> : vector<9xf32>
    %27 = vector.multi_reduction <maximumf>, %26, %cst_13 [1] : vector<9x9xf32> to vector<9xf32>
    %28 = vector.shape_cast %27 : vector<9xf32> to vector<9x1xf32>
    %29 = vector.broadcast %28 : vector<9x1xf32> to vector<9x9xf32>
    %30 = arith.subf %26, %29 : vector<9x9xf32>
    %31 = math.exp %30 : vector<9x9xf32>
    %cst_14 = arith.constant dense<0.000000e+00> : vector<9xf32>
    %32 = vector.multi_reduction <add>, %31, %cst_14 [1] : vector<9x9xf32> to vector<9xf32>
    %33 = vector.shape_cast %32 : vector<9xf32> to vector<9x1xf32>
    %34 = vector.broadcast %33 : vector<9x1xf32> to vector<9x9xf32>
    %35 = arith.divf %31, %34 : vector<9x9xf32>
    %36 = arith.subf %35, %10 : vector<9x9xf32>
    %37 = arith.mulf %36, %17 : vector<9x9xf32>
    %c0_15 = arith.constant 0 : index
    %c0_16 = arith.constant 0 : index
    %c0_17 = arith.constant 0 : index
    %38 = vector.load %arg5[%c0_15, %c0_16, %c0_17] : memref<4x9x9xf32, #tpu.memory_space<vmem>>, vector<1x9x9xf32>
    %39 = vector.shape_cast %38 : vector<1x9x9xf32> to vector<9x9xf32>
    %40 = vector.shape_cast %37 : vector<9x9xf32> to vector<1x9x9xf32>
    tpu.vector_store %arg5[%c0_15, %c0_16, %c0_17], %40 {strides = array<i32>} : memref<4x9x9xf32, #tpu.memory_space<vmem>>, vector<1x9x9xf32>,
    %cst_18 = arith.constant dense<0.000000e+00> : vector<9x9xf32>
    %41 = tpu.matmul %37, %37, %cst_18 {dimension_numbers = #tpu.dot_dimension_numbers<[1], [0], [0], [1], [0, 0, 1, 1], [], []>} : vector<9x9xf32>, vector<9x9xf32>, vector<9x9xf32> -> vector<9x9xf32>
    %cst_19 = arith.constant dense<0.000000e+00> : vector<9x9xf32>
    %42 = tpu.matmul %41, %37, %cst_19 {dimension_numbers = #tpu.dot_dimension_numbers<[1], [0], [0], [1], [0, 0, 1, 1], [], []>} : vector<9x9xf32>, vector<9x9xf32>, vector<9x9xf32> -> vector<9x9xf32>
    %cst_20 = arith.constant dense<0.000000e+00> : vector<9x9xf32>
    %43 = tpu.matmul %42, %37, %cst_20 {dimension_numbers = #tpu.dot_dimension_numbers<[1], [0], [0], [1], [0, 0, 1, 1], [], []>} : vector<9x9xf32>, vector<9x9xf32>, vector<9x9xf32> -> vector<9x9xf32>
    %c0_21 = arith.constant 0 : index
    %c0_22 = arith.constant 0 : index
    %c0_23 = arith.constant 0 : index
    %44 = vector.load %arg6[%c0_21, %c0_22, %c0_23] : memref<4x9x9xf32, #tpu.memory_space<vmem>>, vector<1x9x9xf32>
    %45 = vector.shape_cast %44 : vector<1x9x9xf32> to vector<9x9xf32>
    %46 = vector.shape_cast %43 : vector<9x9xf32> to vector<1x9x9xf32>
    tpu.vector_store %arg6[%c0_21, %c0_22, %c0_23], %46 {strides = array<i32>} : memref<4x9x9xf32, #tpu.memory_space<vmem>>, vector<1x9x9xf32>,
    %47 = vector.extract_strided_slice %2 {offsets = [0, 8], sizes = [9, 8], strides = [1, 1]} : vector<9x32xf32> to vector<9x8xf32>
    %48 = vector.extract_strided_slice %5 {offsets = [0, 8], sizes = [9, 8], strides = [1, 1]} : vector<9x32xf32> to vector<9x8xf32>
    %cst_24 = arith.constant dense<0.000000e+00> : vector<9x9xf32>
    %49 = tpu.matmul %47, %48, %cst_24 {dimension_numbers = #tpu.dot_dimension_numbers<[1], [1], [0], [0], [0, 0, 1, 0], [], []>} : vector<9x8xf32>, vector<9x8xf32>, vector<9x9xf32> -> vector<9x9xf32>
    %cst_25 = arith.constant 0.353553385 : f32
    %50 = vector.broadcast %cst_25 : f32 to vector<9x9xf32>
    %51 = arith.mulf %49, %50 : vector<9x9xf32>
    %c0_i32_26 = arith.constant 0 : i32
    %52 = vector.broadcast %c0_i32_26 : i32 to vector<9x9xi32>
    %53 = arith.cmpi sgt, %7, %52 : vector<9x9xi32>
    %cst_27 = arith.constant -1.000000e+30 : f32
    %54 = vector.broadcast %cst_27 : f32 to vector<9x9xf32>
    %55 = arith.select %53, %51, %54 : vector<9x9xi1>, vector<9x9xf32>
    %cst_28 = arith.constant dense<0xFF800000> : vector<9xf32>
    %56 = vector.multi_reduction <maximumf>, %55, %cst_28 [1] : vector<9x9xf32> to vector<9xf32>
    %57 = vector.shape_cast %56 : vector<9xf32> to vector<9x1xf32>
    %58 = vector.broadcast %57 : vector<9x1xf32> to vector<9x9xf32>
    %59 = arith.subf %55, %58 : vector<9x9xf32>
    %60 = math.exp %59 : vector<9x9xf32>
    %cst_29 = arith.constant dense<0.000000e+00> : vector<9xf32>
    %61 = vector.multi_reduction <add>, %60, %cst_29 [1] : vector<9x9xf32> to vector<9xf32>
    %62 = vector.shape_cast %61 : vector<9xf32> to vector<9x1xf32>
    %63 = vector.broadcast %62 : vector<9x1xf32> to vector<9x9xf32>
    %64 = arith.divf %60, %63 : vector<9x9xf32>
    %65 = arith.subf %64, %10 : vector<9x9xf32>
    %66 = arith.mulf %65, %17 : vector<9x9xf32>
    %c1 = arith.constant 1 : index
    %c0_30 = arith.constant 0 : index
    %c0_31 = arith.constant 0 : index
    %67 = vector.load %arg5[%c1, %c0_30, %c0_31] : memref<4x9x9xf32, #tpu.memory_space<vmem>>, vector<1x9x9xf32>
    %68 = vector.shape_cast %67 : vector<1x9x9xf32> to vector<9x9xf32>
    %69 = vector.shape_cast %66 : vector<9x9xf32> to vector<1x9x9xf32>
    tpu.vector_store %arg5[%c1, %c0_30, %c0_31], %69 {strides = array<i32>} : memref<4x9x9xf32, #tpu.memory_space<vmem>>, vector<1x9x9xf32>,
    %cst_32 = arith.constant dense<0.000000e+00> : vector<9x9xf32>
    %70 = tpu.matmul %66, %66, %cst_32 {dimension_numbers = #tpu.dot_dimension_numbers<[1], [0], [0], [1], [0, 0, 1, 1], [], []>} : vector<9x9xf32>, vector<9x9xf32>, vector<9x9xf32> -> vector<9x9xf32>
    %cst_33 = arith.constant dense<0.000000e+00> : vector<9x9xf32>
    %71 = tpu.matmul %70, %66, %cst_33 {dimension_numbers = #tpu.dot_dimension_numbers<[1], [0], [0], [1], [0, 0, 1, 1], [], []>} : vector<9x9xf32>, vector<9x9xf32>, vector<9x9xf32> -> vector<9x9xf32>
    %cst_34 = arith.constant dense<0.000000e+00> : vector<9x9xf32>
    %72 = tpu.matmul %71, %66, %cst_34 {dimension_numbers = #tpu.dot_dimension_numbers<[1], [0], [0], [1], [0, 0, 1, 1], [], []>} : vector<9x9xf32>, vector<9x9xf32>, vector<9x9xf32> -> vector<9x9xf32>
    %c1_35 = arith.constant 1 : index
    %c0_36 = arith.constant 0 : index
    %c0_37 = arith.constant 0 : index
    %73 = vector.load %arg6[%c1_35, %c0_36, %c0_37] : memref<4x9x9xf32, #tpu.memory_space<vmem>>, vector<1x9x9xf32>
    %74 = vector.shape_cast %73 : vector<1x9x9xf32> to vector<9x9xf32>
    %75 = vector.shape_cast %72 : vector<9x9xf32> to vector<1x9x9xf32>
    tpu.vector_store %arg6[%c1_35, %c0_36, %c0_37], %75 {strides = array<i32>} : memref<4x9x9xf32, #tpu.memory_space<vmem>>, vector<1x9x9xf32>,
    %76 = vector.extract_strided_slice %2 {offsets = [0, 16], sizes = [9, 8], strides = [1, 1]} : vector<9x32xf32> to vector<9x8xf32>
    %77 = vector.extract_strided_slice %5 {offsets = [0, 16], sizes = [9, 8], strides = [1, 1]} : vector<9x32xf32> to vector<9x8xf32>
    %cst_38 = arith.constant dense<0.000000e+00> : vector<9x9xf32>
    %78 = tpu.matmul %76, %77, %cst_38 {dimension_numbers = #tpu.dot_dimension_numbers<[1], [1], [0], [0], [0, 0, 1, 0], [], []>} : vector<9x8xf32>, vector<9x8xf32>, vector<9x9xf32> -> vector<9x9xf32>
    %cst_39 = arith.constant 0.353553385 : f32
    %79 = vector.broadcast %cst_39 : f32 to vector<9x9xf32>
    %80 = arith.mulf %78, %79 : vector<9x9xf32>
    %c0_i32_40 = arith.constant 0 : i32
    %81 = vector.broadcast %c0_i32_40 : i32 to vector<9x9xi32>
    %82 = arith.cmpi sgt, %7, %81 : vector<9x9xi32>
    %cst_41 = arith.constant -1.000000e+30 : f32
    %83 = vector.broadcast %cst_41 : f32 to vector<9x9xf32>
    %84 = arith.select %82, %80, %83 : vector<9x9xi1>, vector<9x9xf32>
    %cst_42 = arith.constant dense<0xFF800000> : vector<9xf32>
    %85 = vector.multi_reduction <maximumf>, %84, %cst_42 [1] : vector<9x9xf32> to vector<9xf32>
    %86 = vector.shape_cast %85 : vector<9xf32> to vector<9x1xf32>
    %87 = vector.broadcast %86 : vector<9x1xf32> to vector<9x9xf32>
    %88 = arith.subf %84, %87 : vector<9x9xf32>
    %89 = math.exp %88 : vector<9x9xf32>
    %cst_43 = arith.constant dense<0.000000e+00> : vector<9xf32>
    %90 = vector.multi_reduction <add>, %89, %cst_43 [1] : vector<9x9xf32> to vector<9xf32>
    %91 = vector.shape_cast %90 : vector<9xf32> to vector<9x1xf32>
    %92 = vector.broadcast %91 : vector<9x1xf32> to vector<9x9xf32>
    %93 = arith.divf %89, %92 : vector<9x9xf32>
    %94 = arith.subf %93, %10 : vector<9x9xf32>
    %95 = arith.mulf %94, %17 : vector<9x9xf32>
    %c2 = arith.constant 2 : index
    %c0_44 = arith.constant 0 : index
    %c0_45 = arith.constant 0 : index
    %96 = vector.load %arg5[%c2, %c0_44, %c0_45] : memref<4x9x9xf32, #tpu.memory_space<vmem>>, vector<1x9x9xf32>
    %97 = vector.shape_cast %96 : vector<1x9x9xf32> to vector<9x9xf32>
    %98 = vector.shape_cast %95 : vector<9x9xf32> to vector<1x9x9xf32>
    tpu.vector_store %arg5[%c2, %c0_44, %c0_45], %98 {strides = array<i32>} : memref<4x9x9xf32, #tpu.memory_space<vmem>>, vector<1x9x9xf32>,
    %cst_46 = arith.constant dense<0.000000e+00> : vector<9x9xf32>
    %99 = tpu.matmul %95, %95, %cst_46 {dimension_numbers = #tpu.dot_dimension_numbers<[1], [0], [0], [1], [0, 0, 1, 1], [], []>} : vector<9x9xf32>, vector<9x9xf32>, vector<9x9xf32> -> vector<9x9xf32>
    %cst_47 = arith.constant dense<0.000000e+00> : vector<9x9xf32>
    %100 = tpu.matmul %99, %95, %cst_47 {dimension_numbers = #tpu.dot_dimension_numbers<[1], [0], [0], [1], [0, 0, 1, 1], [], []>} : vector<9x9xf32>, vector<9x9xf32>, vector<9x9xf32> -> vector<9x9xf32>
    %cst_48 = arith.constant dense<0.000000e+00> : vector<9x9xf32>
    %101 = tpu.matmul %100, %95, %cst_48 {dimension_numbers = #tpu.dot_dimension_numbers<[1], [0], [0], [1], [0, 0, 1, 1], [], []>} : vector<9x9xf32>, vector<9x9xf32>, vector<9x9xf32> -> vector<9x9xf32>
    %c2_49 = arith.constant 2 : index
    %c0_50 = arith.constant 0 : index
    %c0_51 = arith.constant 0 : index
    %102 = vector.load %arg6[%c2_49, %c0_50, %c0_51] : memref<4x9x9xf32, #tpu.memory_space<vmem>>, vector<1x9x9xf32>
    %103 = vector.shape_cast %102 : vector<1x9x9xf32> to vector<9x9xf32>
    %104 = vector.shape_cast %101 : vector<9x9xf32> to vector<1x9x9xf32>
    tpu.vector_store %arg6[%c2_49, %c0_50, %c0_51], %104 {strides = array<i32>} : memref<4x9x9xf32, #tpu.memory_space<vmem>>, vector<1x9x9xf32>,
    %105 = vector.extract_strided_slice %2 {offsets = [0, 24], sizes = [9, 8], strides = [1, 1]} : vector<9x32xf32> to vector<9x8xf32>
    %106 = vector.extract_strided_slice %5 {offsets = [0, 24], sizes = [9, 8], strides = [1, 1]} : vector<9x32xf32> to vector<9x8xf32>
    %cst_52 = arith.constant dense<0.000000e+00> : vector<9x9xf32>
    %107 = tpu.matmul %105, %106, %cst_52 {dimension_numbers = #tpu.dot_dimension_numbers<[1], [1], [0], [0], [0, 0, 1, 0], [], []>} : vector<9x8xf32>, vector<9x8xf32>, vector<9x9xf32> -> vector<9x9xf32>
    %cst_53 = arith.constant 0.353553385 : f32
    %108 = vector.broadcast %cst_53 : f32 to vector<9x9xf32>
    %109 = arith.mulf %107, %108 : vector<9x9xf32>
    %c0_i32_54 = arith.constant 0 : i32
    %110 = vector.broadcast %c0_i32_54 : i32 to vector<9x9xi32>
    %111 = arith.cmpi sgt, %7, %110 : vector<9x9xi32>
    %cst_55 = arith.constant -1.000000e+30 : f32
    %112 = vector.broadcast %cst_55 : f32 to vector<9x9xf32>
    %113 = arith.select %111, %109, %112 : vector<9x9xi1>, vector<9x9xf32>
    %cst_56 = arith.constant dense<0xFF800000> : vector<9xf32>
    %114 = vector.multi_reduction <maximumf>, %113, %cst_56 [1] : vector<9x9xf32> to vector<9xf32>
    %115 = vector.shape_cast %114 : vector<9xf32> to vector<9x1xf32>
    %116 = vector.broadcast %115 : vector<9x1xf32> to vector<9x9xf32>
    %117 = arith.subf %113, %116 : vector<9x9xf32>
    %118 = math.exp %117 : vector<9x9xf32>
    %cst_57 = arith.constant dense<0.000000e+00> : vector<9xf32>
    %119 = vector.multi_reduction <add>, %118, %cst_57 [1] : vector<9x9xf32> to vector<9xf32>
    %120 = vector.shape_cast %119 : vector<9xf32> to vector<9x1xf32>
    %121 = vector.broadcast %120 : vector<9x1xf32> to vector<9x9xf32>
    %122 = arith.divf %118, %121 : vector<9x9xf32>
    %123 = arith.subf %122, %10 : vector<9x9xf32>
    %124 = arith.mulf %123, %17 : vector<9x9xf32>
    %c3 = arith.constant 3 : index
    %c0_58 = arith.constant 0 : index
    %c0_59 = arith.constant 0 : index
    %125 = vector.load %arg5[%c3, %c0_58, %c0_59] : memref<4x9x9xf32, #tpu.memory_space<vmem>>, vector<1x9x9xf32>
    %126 = vector.shape_cast %125 : vector<1x9x9xf32> to vector<9x9xf32>
    %127 = vector.shape_cast %124 : vector<9x9xf32> to vector<1x9x9xf32>
    tpu.vector_store %arg5[%c3, %c0_58, %c0_59], %127 {strides = array<i32>} : memref<4x9x9xf32, #tpu.memory_space<vmem>>, vector<1x9x9xf32>,
    %cst_60 = arith.constant dense<0.000000e+00> : vector<9x9xf32>
    %128 = tpu.matmul %124, %124, %cst_60 {dimension_numbers = #tpu.dot_dimension_numbers<[1], [0], [0], [1], [0, 0, 1, 1], [], []>} : vector<9x9xf32>, vector<9x9xf32>, vector<9x9xf32> -> vector<9x9xf32>
    %cst_61 = arith.constant dense<0.000000e+00> : vector<9x9xf32>
    %129 = tpu.matmul %128, %124, %cst_61 {dimension_numbers = #tpu.dot_dimension_numbers<[1], [0], [0], [1], [0, 0, 1, 1], [], []>} : vector<9x9xf32>, vector<9x9xf32>, vector<9x9xf32> -> vector<9x9xf32>
    %cst_62 = arith.constant dense<0.000000e+00> : vector<9x9xf32>
    %130 = tpu.matmul %129, %124, %cst_62 {dimension_numbers = #tpu.dot_dimension_numbers<[1], [0], [0], [1], [0, 0, 1, 1], [], []>} : vector<9x9xf32>, vector<9x9xf32>, vector<9x9xf32> -> vector<9x9xf32>
    %c3_63 = arith.constant 3 : index
    %c0_64 = arith.constant 0 : index
    %c0_65 = arith.constant 0 : index
    %131 = vector.load %arg6[%c3_63, %c0_64, %c0_65] : memref<4x9x9xf32, #tpu.memory_space<vmem>>, vector<1x9x9xf32>
    %132 = vector.shape_cast %131 : vector<1x9x9xf32> to vector<9x9xf32>
    %133 = vector.shape_cast %130 : vector<9x9xf32> to vector<1x9x9xf32>
    tpu.vector_store %arg6[%c3_63, %c0_64, %c0_65], %133 {strides = array<i32>} : memref<4x9x9xf32, #tpu.memory_space<vmem>>, vector<1x9x9xf32>,
    return
  }
  func.func @transform_0(%arg0: i32) -> (i32, i32) {
    %c0_i32 = arith.constant 0 : i32
    %c0_i32_0 = arith.constant 0 : i32
    %c0_i32_1 = arith.constant 0 : i32
    return %c0_i32, %c0_i32_0 : i32, i32
  }
  func.func @transform_1(%arg0: i32) -> (i32, i32) {
    %c0_i32 = arith.constant 0 : i32
    %c0_i32_0 = arith.constant 0 : i32
    %c0_i32_1 = arith.constant 0 : i32
    return %c0_i32, %c0_i32_0 : i32, i32
  }
  func.func @transform_2(%arg0: i32) -> (i32, i32) {
    %c0_i32 = arith.constant 0 : i32
    %c0_i32_0 = arith.constant 0 : i32
    %c0_i32_1 = arith.constant 0 : i32
    return %c0_i32, %c0_i32_0 : i32, i32
  }
  func.func @transform_3(%arg0: i32) -> (i32, i32) {
    %c0_i32 = arith.constant 0 : i32
    %c0_i32_0 = arith.constant 0 : i32
    %c0_i32_1 = arith.constant 0 : i32
    return %c0_i32, %c0_i32_0 : i32, i32
  }
  func.func @transform_4(%arg0: i32) -> (i32, i32, i32) {
    %c0_i32 = arith.constant 0 : i32
    %c0_i32_0 = arith.constant 0 : i32
    %c0_i32_1 = arith.constant 0 : i32
    %c0_i32_2 = arith.constant 0 : i32
    return %c0_i32, %c0_i32_0, %c0_i32_1 : i32, i32, i32
  }
  func.func @transform_5(%arg0: i32) -> (i32, i32, i32) {
    %c0_i32 = arith.constant 0 : i32
    %c0_i32_0 = arith.constant 0 : i32
    %c0_i32_1 = arith.constant 0 : i32
    %c0_i32_2 = arith.constant 0 : i32
    return %c0_i32, %c0_i32_0, %c0_i32_1 : i32, i32, i32
  }
}

</mosaic_0001>

<bundles_post_ra>
// kernel: tpu_custom_call.1
= control target key start
LH: loop header
LB: loop body
LE: loop exit
PB: predicated region body
PF: predicated region fallthrough
CT: control target
= control target key end

     0   :  { %11 = vsyncpa [#allocation3], 0  ;;  %s1459_s0 = inlined_call_operand.hbm [shape: f32[9,32], index: 0, kind: input, shape index: {}]   ;;  %s1460_s1 = inlined_call_operand.hbm [shape: f32[9,32], index: 1, kind: input, shape index: {}]   ;;  %s1461_s2 = inlined_call_operand.hbm [shape: f32[32,32], index: 2, kind: input, shape index: {}]   ;;  %s1462_s3 = inlined_call_operand.hbm [shape: f32[32,32], index: 3, kind: input, shape index: {}]   ;;  %s1463_s4 = inlined_call_operand.vmem [shape: f32[4,9,9], index: 4, kind: output, shape index: {0}]   ;;  %s1464_s5 = inlined_call_operand.vmem [shape: f32[4,9,9], index: 5, kind: output, shape index: {1}]  }
   0x1   :  { %12 = vsyncpa [#allocation5], 0 }
   0x2   :  { %13 = vsyncpa [#allocation8], 0  ;;  %s31_s20 = sshll.u32 %s1460_s1, 4  ;;  %s1164_s21 = smov [#allocation4]   ;;  %s32_s20 = int_to_ptr.hbm [resolvable:$true] %s31_s20 }
   0x3   :  { %s33_s22 = sshll.u32 %s1164_s21, 4  ;;  %s18_s25 = sshll.u32 %s1459_s0, 4  ;;  %s34_s22 = int_to_ptr.vmem [resolvable:$true] %s33_s22  ;;  %s19_s25 = int_to_ptr.hbm [resolvable:$true] %s18_s25 }
   0x4   :  { %s1165_s26 = smov 128   ;;  %s1166_s27 = smov 8  }
   0x5   :  { %39 = dma.hbm_to_vmem [thread:$0]  %s32_s20, 256, %s34_s22, [#allocation5], %s1165_s26, %s1165_s26, %s1166_s27  }
   0x6   :  { %s1167_s28 = smov [#allocation2]   ;;  %s44_s7 = sshll.u32 %s1461_s2, 4  ;;  %s45_s7 = int_to_ptr.hbm [resolvable:$true] %s44_s7 }
   0x7   :  { %s20_s29 = sshll.u32 %s1167_s28, 4  ;;  %s57_s9 = sshll.u32 %s1462_s3, 4  ;;  %s21_s29 = int_to_ptr.vmem [resolvable:$true] %s20_s29  ;;  %s58_s9 = int_to_ptr.hbm [resolvable:$true] %s57_s9 }
   0x8   :  { %26 = dma.hbm_to_vmem [thread:$0]  %s19_s25, 256, %s21_s29, [#allocation3], %s1165_s26, %s1165_s26, %s1166_s27  }
   0x9   :  { %s1168_s10 = smov [#allocation6]   ;;  %s1169_s0 = smov [#allocation7]  }
   0xa   :  { %s46_s11 = sshll.u32 %s1168_s10, 4  ;;  %s59_s12 = sshll.u32 %s1169_s0, 4  ;;  %s47_s11 = int_to_ptr.vmem [resolvable:$true] %s46_s11  ;;  %s60_s12 = int_to_ptr.vmem [resolvable:$true] %s59_s12 }
   0xb   :  { %52 = dma.hbm_to_vmem [thread:$0]  %s45_s7, 512, %s47_s11, [#allocation5], %s1165_s26, %s1165_s26, %s1166_s27  }
   0xc   :  { %65 = dma.hbm_to_vmem [thread:$0]  %s58_s9, 512, %s60_s12, [#allocation8], %s1165_s26, %s1165_s26, %s1166_s27  }
   0xd   :  { %1158 = dma.done.wait [#allocation3], 256  }
   0xe   :  { %1159 = vsyncadd [#allocation3], 4294967040 }
   0xf   :  { %1160 = dma.done.wait [#allocation5], 768  }
  0x10   :  { %1161 = vsyncadd [#allocation5], 4294966528 }
  0x11   :  { %1162 = dma.done.wait [#allocation8], 512  }
  0x12   :  { %1163 = vsyncadd [#allocation8], 4294966784  ;;  %v87_v0 = vld [vmem:[#allocation6 + $0x18] sm:$0xff]  ;;  %v86_v1 = vld [vmem:[#allocation6 + $0x10] sm:$0xff]  ;;  %vm88_vm0 = vcmask 261120   ;;  %s1170_s2 = smov 120   ;;  %v153_v23 = vlaneseq }
  0x13   :  { %107 = vmatpush.msra.mxu0 %v87_v0  ;;  %1014 = vmatpush.msra.mxu1 %v87_v0  ;;  %v85_v2 = vld [vmem:[#allocation6 + $0x8] sm:$0xff]  ;;  %v84_v3 = vld [vmem:[#allocation6] sm:$0xff]  ;;  %v123_v6 = vld [vmem:[#allocation7 + $0x18] sm:$0xff]  ;;  %vm173_vm1 = vcmask 64512   ;;  %s1171_s3 = smov 112   ;;  %s1172_s13 = smov 104  }
  0x14   :  { %v82_v4 = vld [vmem:[#allocation2] sm:$0xff]  ;;  %v83_v5 = vld [vmem:[#allocation2 + $0x8] sm:$0x1]  ;;  %v122_v7 = vld [vmem:[#allocation7 + $0x10] sm:$0xff]  ;;  %v1232_v25 = vand.u32 127, %v153_v23  ;;  %vm213_vm3 = vcmask 72704  }
  0x15   :  { %108 = vmatpush.msra.mxu0 %v86_v1  ;;  %1015 = vmatpush.msra.mxu1 %v86_v1  ;;  %v121_v8 = vld [vmem:[#allocation7 + $0x8] sm:$0xff]  ;;  %v120_v9 = vld [vmem:[#allocation7] sm:$0xff]  ;;  %v118_v10 = vld [vmem:[#allocation4] sm:$0xff]  ;;  %vm217_vm4 = vcmask 65536   ;;  %vm275_vm10 = vcmask 1040384  }
  0x16   :  { %v119_v11 = vld [vmem:[#allocation4 + $0x8] sm:$0x1]  ;;  %vm166_vm2 = vcmp.gt.s32.totalorder %v1232_v25, 0 }
  0x17   :  { %109 = vmatpush.msra.mxu0 %v85_v2  ;;  %1016 = vmatpush.msra.mxu1 %v85_v2 }
  0x19   :  { %110 = vmatpush.msra.mxu0 %v84_v3  ;;  %1017 = vmatpush.msra.mxu1 %v84_v3 }
  0x1a   :  { %942 = vmatmul.msk.f32.vlgmr.msra.gmra.mxu0 %vm88_vm0, %v82_v4  ;;  %943 = vmatmul.msk.f32.vlgmr.msra.gmra.mxu1 %vm88_vm0, %v83_v5 }
  0x1b   :  { %142 = vmatpush.msrb.mxu1 %v123_v6 }
  0x1d   :  { %143 = vmatpush.msrb.mxu1 %v122_v7 }
  0x1f   :  { %144 = vmatpush.msrb.mxu1 %v121_v8 }
  0x21   :  { %145 = vmatpush.msrb.mxu1 %v120_v9 }
  0x22   :  { %944 = vmatmul.msk.f32.vlgmr.msrb.gmra.mxu1 %vm88_vm0, %v118_v10 }
  0x2a   :  { %945 = vmatmul.msk.f32.gmra.mxu1 %vm88_vm0, %v119_v11 }
  0x97   :  { %v112_v12 = vpop.f32.mrf.mxu0  ;;  %v115_v13 = vpop.f32.mrf.mxu1 }
  0x98   :  { %361 = vrot.lane.b32.xlu1 %v112_v12, %s1170_s2 }
  0x9f   :  { %v147_v14 = vpop.f32.mrf.mxu1 }
  0xa0   :  { %363 = vrot.lane.b32.xlu1 %v115_v13, %s1170_s2 }
  0xa7   :  { %v150_v15 = vpop.f32.mrf.mxu1 }
  0xa8   :  { %557 = vrot.lane.b32.xlu2 %v150_v15, %s1171_s3  ;;  %367 = vrot.lane.b32.xlu0 %v150_v15, %s1170_s2 }
  0xa9   :  { %950 = vmatpush.xpose.msk.msra.mxu2 %vm173_vm1, %v150_v15  ;;  %553 = vrot.lane.b32.xlu1 %v115_v13, %s1171_s3 }
  0xad   :  { %951 = vmatpush.xpose.msk.msra.mxu2 %vm173_vm1, %v147_v14 }
  0xb0   :  { %952 = vmatmul.msk.f32.vlgmr.msra.gmra.mxu2 %vm173_vm1, %v112_v12  ;;  %555 = vrot.lane.b32.xlu2 %v147_v14, %s1171_s3 }
  0xb1   :  { %365 = vrot.lane.b32.xlu0 %v147_v14, %s1170_s2  ;;  %741 = vrot.lane.b32.xlu1 %v112_v12, %s1172_s13 }
  0xb8   :  { %953 = vmatmul.msk.f32.gmra.mxu2 %vm173_vm1, %v115_v13  ;;  %747 = vrot.lane.b32.xlu2 %v150_v15, %s1172_s13 }
  0xb9   :  { %551 = vrot.lane.b32.xlu0 %v112_v12, %s1171_s3 }
  0xc0   :  { %743 = vrot.lane.b32.xlu2 %v115_v13, %s1172_s13 }
  0xc1   :  { %745 = vrot.lane.b32.xlu0 %v147_v14, %s1172_s13 }
 0x102   :  { %v558_v16 = vpop.permute.xlu2 %557 }
 0x10a   :  { %v556_v18 = vpop.permute.xlu2 %555  ;;  %v362_v20 = vpop.permute.xlu1 %361 }
 0x112   :  { %v748_v21 = vpop.permute.xlu2 %747  ;;  %v364_v24 = vpop.permute.xlu1 %363 }
 0x11a   :  { %v368_v17 = vpop.permute.xlu0 %367  ;;  %v744_v37 = vpop.permute.xlu2 %743 }
 0x11b   :  { %963 = vmatpush.xpose.msk.msra.mxu1 %vm173_vm1, %v368_v17  ;;  %v554_v33 = vpop.permute.xlu1 %553 }
 0x123   :  { %v366_v19 = vpop.permute.xlu0 %365  ;;  %v742_v36 = vpop.permute.xlu1 %741 }
 0x124   :  { %964 = vmatpush.xpose.msk.msra.mxu1 %vm173_vm1, %v366_v19 }
 0x127   :  { %965 = vmatmul.msk.f32.vlgmr.msra.gmra.mxu1 %vm173_vm1, %v362_v20 }
 0x128   :  { %980 = vmatpush.xpose.msk.msrb.mxu1 %vm173_vm1, %v558_v16 }
 0x12b   :  { %v552_v22 = vpop.permute.xlu0 %551 }
 0x12c   :  { %981 = vmatpush.xpose.msk.msrb.mxu1 %vm173_vm1, %v556_v18 }
 0x12f   :  { %966 = vmatmul.msk.f32.gmra.mxu1 %vm173_vm1, %v364_v24 }
 0x130   :  { %997 = vmatpush.xpose.msk.msra.mxu1 %vm173_vm1, %v748_v21 }
 0x133   :  { %v746_v26 = vpop.permute.xlu0 %745  ;;  %v203_v27 = vpop.f32.mrf.mxu2 }
 0x134   :  { %v209_v28 = vmul.f32 0.35355338, %v203_v27  ;;  %998 = vmatpush.xpose.msk.msra.mxu1 %vm173_vm1, %v746_v26 }
 0x136   :  { %v211_v29 = vsel %vm166_vm2, %v209_v28, -1e+30 }
 0x137   :  { %982 = vmatmul.msk.f32.vlgmr.msrb.gmra.mxu1 %vm173_vm1, %v552_v22  ;;  %v214_v30 = vsel %vm213_vm3, %v211_v29, -inf }
 0x138   :  { %215 = vmax.xlane.f32.xlu1 %v214_v30 }
 0x13b   :  { %v206_v31 = vpop.f32.mrf.mxu2 }
 0x13c   :  { %v210_v32 = vmul.f32 0.35355338, %v206_v31 }
 0x13e   :  { %v212_v34 = vsel %vm166_vm2, %v210_v32, -1e+30 }
 0x13f   :  { %983 = vmatmul.msk.f32.gmra.mxu1 %vm173_vm1, %v554_v33  ;;  %v218_v35 = vsel %vm217_vm4, %v212_v34, -inf }
 0x140   :  { %219 = vmax.xlane.f32.xlu0 %v218_v35 }
 0x147   :  { %999 = vmatmul.msk.f32.vlgmr.msra.gmra.mxu1 %vm173_vm1, %v742_v36 }
 0x14f   :  { %1000 = vmatmul.msk.f32.gmra.mxu1 %vm173_vm1, %v744_v37 }
 0x1a4   :  { %v394_v38 = vpop.f32.mrf.mxu1 }
 0x1a5   :  { %v400_v43 = vmul.f32 0.35355338, %v394_v38 }
 0x1a7   :  { %v402_v48 = vsel %vm166_vm2, %v400_v43, -1e+30 }
 0x1a8   :  { %v404_v51 = vsel %vm213_vm3, %v402_v48, -inf }
 0x1ab   :  { %v216_v59 = vpop.xlane.xlu1 %215 }
 0x1ac   :  { %v397_v39 = vpop.f32.mrf.mxu1  ;;  %v221_v62 = vsub.f32 %v211_v29, %v216_v59  ;;  %v1288_v29 = vshrl.u32 %v153_v23, 7 }
 0x1ad   :  { %v401_v40 = vmul.f32 0.35355338, %v397_v39 }
 0x1ae   :  { %v223_v1 = vmul.f32 1.442695, %v221_v62  ;;  %vm164_vm12 = vcmp.gt.s32.totalorder %v1288_v29, 0  ;;  %vm158_vm13 = vcmp.eq.s32.totalorder %v1288_v29, %v1232_v25 }
 0x1af   :  { %v403_v41 = vsel %vm166_vm2, %v401_v40, -1e+30  ;;  %vm167_vm0 = vmand %vm164_vm12, %vm166_vm2 }
 0x1b0   :  { %v407_v42 = vsel %vm217_vm4, %v403_v41, -inf }
 0x1b1   :  { %408 = vmax.xlane.f32.xlu2 %v407_v42 }
 0x1b3   :  { %v220_v44 = vpop.xlane.xlu0 %219 }
 0x1b4   :  { %v222_v45 = vsub.f32 %v212_v34, %v220_v44  ;;  %v584_v46 = vpop.f32.mrf.mxu1  ;;  %v155_v34 = vadd.s32 8, %v1288_v29 }
 0x1b5   :  { %v590_v47 = vmul.f32 0.35355338, %v584_v46 }
 0x1b6   :  { %v225_v49 = vmul.f32 1.442695, %v222_v45  ;;  %vm159_vm6 = vcmp.eq.s32.totalorder %v155_v34, %v1232_v25  ;;  %v1173_v45 = vmov 0.0  }
 0x1b7   :  { %v592_v50 = vsel %vm166_vm2, %v590_v47, -1e+30  ;;  %v1296_v46 = vsel %vm159_vm6, 1.0, %v1173_v45 }
 0x1b8   :  { %1030 = vpow2.f32 %v225_v49  ;;  %v594_v52 = vsel %vm213_vm3, %v592_v50, -inf }
 0x1b9   :  { %405 = vmax.xlane.f32.xlu2 %v404_v51  ;;  %595 = vmax.xlane.f32.xlu1 %v594_v52  ;;  %1032 = vpow2.f32 %v223_v1  ;;  %v1304_v51 = vsel %vm166_vm2, 1.0, %v1173_v45 }
 0x1bc   :  { %v587_v53 = vpop.f32.mrf.mxu1 }
 0x1bd   :  { %v591_v54 = vmul.f32 0.35355338, %v587_v53 }
 0x1be   :  { %v1255_v55 = vpop.eup %1030 }
 0x1bf   :  { %v593_v56 = vsel %vm166_vm2, %v591_v54, -1e+30  ;;  %v230_v57 = vsel %vm217_vm4, %v1255_v55, 0.0  ;;  %v1271_v6 = vpop.eup %1032 }
 0x1c0   :  { %v597_v58 = vsel %vm217_vm4, %v593_v56, -inf  ;;  %v227_v7 = vsel %vm213_vm3, %v1271_v6, 0.0 }
 0x1c1   :  { %598 = vmax.xlane.f32.xlu0 %v597_v58  ;;  %231 = vadd.xlane.f32.xlu1 %v230_v57 }
 0x1c4   :  { %v774_v60 = vpop.f32.mrf.mxu1 }
 0x1c5   :  { %v780_v61 = vmul.f32 0.35355338, %v774_v60 }
 0x1c7   :  { %v782_v63 = vsel %vm166_vm2, %v780_v61, -1e+30 }
 0x1c8   :  { %v784_v0 = vsel %vm213_vm3, %v782_v63, -inf }
 0x1c9   :  { %785 = vmax.xlane.f32.xlu0 %v784_v0 }
 0x1cc   :  { %v777_v2 = vpop.f32.mrf.mxu1 }
 0x1cd   :  { %v781_v3 = vmul.f32 0.35355338, %v777_v2 }
 0x1cf   :  { %v1267_v4 = vsel %vm166_vm2, %v781_v3, -1e+30 }
 0x1d0   :  { %v787_v5 = vsel %vm217_vm4, %v1267_v4, -inf }
 0x1d1   :  { %788 = vmax.xlane.f32.xlu2 %v787_v5 }
 0x1d9   :  { %228 = vadd.xlane.f32.xlu2 %v227_v7 }
 0x224   :  { %v409_v8 = vpop.xlane.xlu2 %408 }
 0x225   :  { %v411_v9 = vsub.f32 %v403_v41, %v409_v8  ;;  %v1329_v8 = vsel %vm167_vm0, 1.0, %v1173_v45 }
 0x227   :  { %v414_v10 = vmul.f32 1.442695, %v411_v9 }
 0x229   :  { %1034 = vpow2.f32 %v414_v10 }
 0x22c   :  { %v406_v11 = vpop.xlane.xlu2 %405  ;;  %v596_v12 = vpop.xlane.xlu1 %595 }
 0x22d   :  { %v410_v13 = vsub.f32 %v402_v48, %v406_v11  ;;  %v600_v14 = vsub.f32 %v592_v50, %v596_v12 }
 0x22f   :  { %v1275_v15 = vpop.eup %1034  ;;  %v412_v16 = vmul.f32 1.442695, %v410_v13  ;;  %v602_v17 = vmul.f32 1.442695, %v600_v14 }
 0x230   :  { %v419_v18 = vsel %vm217_vm4, %v1275_v15, 0.0 }
 0x231   :  { %1036 = vpow2.f32 %v412_v16  ;;  %420 = vadd.xlane.f32.xlu0 %v419_v18 }
 0x232   :  { %1038 = vpow2.f32 %v602_v17 }
 0x234   :  { %v232_v19 = vpop.xlane.xlu1 %231  ;;  %v599_v20 = vpop.xlane.xlu0 %598 }
 0x235   :  { %1040 = vrcp.f32 %v232_v19  ;;  %v601_v21 = vsub.f32 %v593_v56, %v599_v20  ;;  %v259_v36 = vand.u32 2147483648, %v232_v19  ;;  %v257_v40 = vand.u32 2147483647, %v232_v19 }
 0x236   :  { %vm253_vm7 = vweird.f32 %v232_v19 }
 0x237   :  { %v1279_v22 = vpop.eup %1036  ;;  %v604_v26 = vmul.f32 1.442695, %v601_v21  ;;  %v260_v42 = vor.u32 1.1754944e-38, %v259_v36  ;;  %vm258_vm9 = vcmp.eq.f32.partialorder %v257_v40, 8.507059e+37 }
 0x238   :  { %v1281_v24 = vpop.eup %1038  ;;  %v416_v27 = vsel %vm213_vm3, %v1279_v22, 0.0 }
 0x239   :  { %v606_v28 = vsel %vm213_vm3, %v1281_v24, 0.0  ;;  %417 = vadd.xlane.f32.xlu1 %v416_v27  ;;  %1042 = vpow2.f32 %v604_v26 }
 0x23a   :  { %607 = vadd.xlane.f32.xlu0 %v606_v28 }
 0x23b   :  { %v1041_v30 = vpop.eup %1040 }
 0x23c   :  { %v249_v31 = vmul.f32 %v1041_v30, %v232_v19  ;;  %v786_v32 = vpop.xlane.xlu0 %785  ;;  %vm254_vm5 = vweird.f32 %v1041_v30 }
 0x23d   :  { %v790_v33 = vsub.f32 %v782_v63, %v786_v32  ;;  %vm255_vm8 = vmor %vm253_vm7, %vm254_vm5 }
 0x23e   :  { %v250_v35 = vsub.f32 1.0, %v249_v31 }
 0x23f   :  { %v792_v37 = vmul.f32 1.442695, %v790_v33  ;;  %v1291_v38 = vpop.eup %1042 }
 0x240   :  { %v251_v39 = vmul.f32 %v1041_v30, %v250_v35  ;;  %v609_v23 = vsel %vm217_vm4, %v1291_v38, 0.0 }
 0x241   :  { %1044 = vpow2.f32 %v792_v37  ;;  %610 = vadd.xlane.f32.xlu2 %v609_v23 }
 0x242   :  { %v252_v41 = vadd.f32 %v1041_v30, %v251_v39 }
 0x244   :  { %v256_v43 = vsel %vm255_vm8, %v1041_v30, %v252_v41  ;;  %v789_v44 = vpop.xlane.xlu2 %788 }
 0x245   :  { %v261_v47 = vsel %vm258_vm9, %v260_v42, %v256_v43  ;;  %v791_v48 = vsub.f32 %v1267_v4, %v789_v44  ;;  %v1326_v4 = vsel %vm158_vm13, 1.0, %v1173_v45 }
 0x246   :  { %v262_v49 = vmul.f32 %v1255_v55, %v261_v47 }
 0x247   :  { %v1300_v50 = vpop.eup %1044  ;;  %v794_v52 = vmul.f32 1.442695, %v791_v48 }
 0x248   :  { %v264_v53 = vsub.f32 %v262_v49, %v1296_v46  ;;  %v796_v54 = vsel %vm213_vm3, %v1300_v50, 0.0 }
 0x249   :  { %1046 = vpow2.f32 %v794_v52  ;;  %797 = vadd.xlane.f32.xlu2 %v796_v54 }
 0x24a   :  { %v266_v56 = vmul.f32 %v1304_v51, %v264_v53 }
 0x24c   :  { %268 = vst.msk [vmem:[%s1463_s4 + $0x8] sm:$0x1] %vm217_vm4, %v266_v56  ;;  %v229_v55 = vpop.xlane.xlu2 %228  ;;  %954 = vmatpush.msk.msrb.mxu2 %vm275_vm10, %v266_v56  ;;  %1018 = vmatpush.msk.msra.mxu3 %vm275_vm10, %v266_v56 }
 0x24d   :  { %1048 = vrcp.f32 %v229_v55  ;;  %960 = vmatpush.msk.msrb.mxu0 %vm275_vm10, %v266_v56  ;;  %v244_v62 = vand.u32 2147483648, %v229_v55  ;;  %v242_v0 = vand.u32 2147483647, %v229_v55  ;;  %vm238_vm14 = vweird.f32 %v229_v55 }
 0x24f   :  { %v1317_v57 = vpop.eup %1046  ;;  %v245_v2 = vor.u32 1.1754944e-38, %v244_v62  ;;  %vm243_vm1 = vcmp.eq.f32.partialorder %v242_v0, 8.507059e+37 }
 0x250   :  { %v799_v58 = vsel %vm217_vm4, %v1317_v57, 0.0 }
 0x251   :  { %800 = vadd.xlane.f32.xlu1 %v799_v58 }
 0x253   :  { %v1049_v59 = vpop.eup %1048 }
 0x254   :  { %v234_v60 = vmul.f32 %v1049_v59, %v229_v55  ;;  %vm239_vm11 = vweird.f32 %v1049_v59 }
 0x255   :  { %vm240_vm15 = vmor %vm238_vm14, %vm239_vm11 }
 0x256   :  { %v235_v61 = vsub.f32 1.0, %v234_v60 }
 0x258   :  { %v236_v63 = vmul.f32 %v1049_v59, %v235_v61 }
 0x25a   :  { %v237_v1 = vadd.f32 %v1049_v59, %v236_v63 }
 0x25c   :  { %v241_v3 = vsel %vm240_vm15, %v1049_v59, %v237_v1 }
 0x25d   :  { %v246_v5 = vsel %vm243_vm1, %v245_v2, %v241_v3 }
 0x25e   :  { %v247_v7 = vmul.f32 %v1271_v6, %v246_v5 }
 0x260   :  { %v263_v9 = vsub.f32 %v247_v7, %v1326_v4 }
 0x262   :  { %v265_v10 = vmul.f32 %v1329_v8, %v263_v9 }
 0x264   :  { %267 = vst.msk [vmem:[%s1463_s4] sm:$0xff] %vm213_vm3, %v265_v10  ;;  %293 = vmatpush.msrb.mxu2 %v265_v10  ;;  %1019 = vmatpush.msra.mxu3 %v265_v10 }
 0x265   :  { %351 = vmatpush.msrb.mxu0 %v265_v10  ;;  %955 = vmatmul.msk.f32.vlgmr.msrb.gmra.mxu2 %vm213_vm3, %v265_v10 }
 0x266   :  { %956 = vmatmul.msk.f32.vlgmr.msra.gmra.mxu3 %vm213_vm3, %v266_v56 }
 0x267   :  { %957 = vmatpush.msk.msrb.mxu3 %vm275_vm10, %v266_v56 }
 0x269   :  { %322 = vmatpush.msrb.mxu3 %v265_v10 }
 0x2a4   :  { %v421_v25 = vpop.xlane.xlu0 %420 }
 0x2a5   :  { %1050 = vrcp.f32 %v421_v25  ;;  %v448_v16 = vand.u32 2147483648, %v421_v25  ;;  %v446_v18 = vand.u32 2147483647, %v421_v25  ;;  %vm442_vm5 = vweird.f32 %v421_v25 }
 0x2a7   :  { %v449_v21 = vor.u32 1.1754944e-38, %v448_v16  ;;  %vm447_vm7 = vcmp.eq.f32.partialorder %v446_v18, 8.507059e+37 }
 0x2ab   :  { %v1051_v6 = vpop.eup %1050 }
 0x2ac   :  { %v438_v11 = vmul.f32 %v1051_v6, %v421_v25  ;;  %v418_v12 = vpop.xlane.xlu1 %417  ;;  %vm443_vm2 = vweird.f32 %v1051_v6 }
 0x2ad   :  { %1052 = vrcp.f32 %v418_v12  ;;  %v608_v13 = vpop.xlane.xlu0 %607  ;;  %vm444_vm6 = vmor %vm442_vm5, %vm443_vm2  ;;  %v431_v34 = vand.u32 2147483647, %v418_v12  ;;  %v433_v35 = vand.u32 2147483648, %v418_v12  ;;  %vm427_vm11 = vweird.f32 %v418_v12 }
 0x2ae   :  { %v439_v14 = vsub.f32 1.0, %v438_v11  ;;  %1054 = vrcp.f32 %v608_v13  ;;  %v623_v39 = vand.u32 2147483648, %v608_v13  ;;  %v621_v41 = vand.u32 2147483647, %v608_v13 }
 0x2af   :  { %vm617_vm13 = vweird.f32 %v608_v13  ;;  %vm432_vm14 = vcmp.eq.f32.partialorder %v431_v34, 8.507059e+37 }
 0x2b0   :  { %v440_v17 = vmul.f32 %v1051_v6, %v439_v14  ;;  %v624_v48 = vor.u32 1.1754944e-38, %v623_v39  ;;  %vm622_vm0 = vcmp.eq.f32.partialorder %v621_v41, 8.507059e+37 }
 0x2b2   :  { %v441_v19 = vadd.f32 %v1051_v6, %v440_v17 }
 0x2b3   :  { %v1053_v20 = vpop.eup %1052 }
 0x2b4   :  { %v1055_v26 = vpop.eup %1054  ;;  %v445_v27 = vsel %vm444_vm6, %v1051_v6, %v441_v19  ;;  %v423_v28 = vmul.f32 %v1053_v20, %v418_v12  ;;  %v611_v31 = vpop.xlane.xlu2 %610  ;;  %vm428_vm8 = vweird.f32 %v1053_v20 }
 0x2b5   :  { %v450_v29 = vsel %vm447_vm7, %v449_v21, %v445_v27  ;;  %v613_v30 = vmul.f32 %v1055_v26, %v608_v13  ;;  %1056 = vrcp.f32 %v611_v31  ;;  %vm618_vm9 = vweird.f32 %v1055_v26  ;;  %vm429_vm12 = vmor %vm427_vm11, %vm428_vm8 }
 0x2b6   :  { %v451_v32 = vmul.f32 %v1275_v15, %v450_v29  ;;  %v424_v33 = vsub.f32 1.0, %v423_v28  ;;  %v434_v15 = vor.u32 1.1754944e-38, %v433_v35  ;;  %vm619_vm15 = vmor %vm617_vm13, %vm618_vm9  ;;  %v638_v60 = vand.u32 2147483648, %v611_v31 }
 0x2b7   :  { %v614_v36 = vsub.f32 1.0, %v613_v30  ;;  %v636_v0 = vand.u32 2147483647, %v611_v31  ;;  %vm632_vm2 = vweird.f32 %v611_v31 }
 0x2b8   :  { %v425_v37 = vmul.f32 %v1053_v20, %v424_v33  ;;  %v453_v40 = vsub.f32 %v451_v32, %v1296_v46  ;;  %v639_v5 = vor.u32 1.1754944e-38, %v638_v60 }
 0x2b9   :  { %v615_v23 = vmul.f32 %v1055_v26, %v614_v36  ;;  %vm637_vm6 = vcmp.eq.f32.partialorder %v636_v0, 8.507059e+37 }
 0x2ba   :  { %v426_v42 = vadd.f32 %v1053_v20, %v425_v37  ;;  %v1343_v43 = vmul.f32 %v1304_v51, %v453_v40 }
 0x2bb   :  { %v616_v44 = vadd.f32 %v1055_v26, %v615_v23  ;;  %v1057_v45 = vpop.eup %1056 }
 0x2bc   :  { %v430_v47 = vsel %vm429_vm12, %v1053_v20, %v426_v42  ;;  %968 = vst.msk [vmem:[%s1463_s4 + $0x18] sm:$0x1] %vm217_vm4, %v1343_v43  ;;  %969 = vmatpush.msk.msra.mxu2 %vm275_vm10, %v1343_v43  ;;  %972 = vmatpush.msk.msra.mxu3 %vm275_vm10, %v1343_v43  ;;  %v628_v53 = vmul.f32 %v1057_v45, %v611_v31  ;;  %v798_v54 = vpop.xlane.xlu2 %797  ;;  %vm633_vm1 = vweird.f32 %v1057_v45 }
 0x2bd   :  { %v435_v49 = vsel %vm432_vm14, %v434_v15, %v430_v47  ;;  %v620_v52 = vsel %vm619_vm15, %v1055_v26, %v616_v44  ;;  %975 = vmatpush.msk.msra.mxu0 %vm275_vm10, %v1343_v43  ;;  %1058 = vrcp.f32 %v798_v54  ;;  %vm634_vm5 = vmor %vm632_vm2, %vm633_vm1  ;;  %v813_v11 = vand.u32 2147483648, %v798_v54 }
 0x2be   :  { %v436_v56 = vmul.f32 %v1279_v22, %v435_v49  ;;  %v625_v55 = vsel %vm622_vm0, %v624_v48, %v620_v52  ;;  %v629_v59 = vsub.f32 1.0, %v628_v53  ;;  %v811_v13 = vand.u32 2147483647, %v798_v54 }
 0x2bf   :  { %v626_v58 = vmul.f32 %v1281_v24, %v625_v55  ;;  %vm807_vm8 = vweird.f32 %v798_v54  ;;  %v814_v19 = vor.u32 1.1754944e-38, %v813_v11 }
 0x2c0   :  { %v452_v61 = vsub.f32 %v436_v56, %v1326_v4  ;;  %v630_v63 = vmul.f32 %v1057_v45, %v629_v59  ;;  %vm812_vm11 = vcmp.eq.f32.partialorder %v811_v13, 8.507059e+37 }
 0x2c1   :  { %v642_v62 = vsub.f32 %v626_v58, %v1326_v4 }
 0x2c2   :  { %v454_v1 = vmul.f32 %v1329_v8, %v452_v61  ;;  %v631_v2 = vadd.f32 %v1057_v45, %v630_v63 }
 0x2c3   :  { %v1362_v3 = vmul.f32 %v1329_v8, %v642_v62  ;;  %v1059_v22 = vpop.eup %1058 }
 0x2c4   :  { %v801_v24 = vpop.xlane.xlu1 %800  ;;  %967 = vst.msk [vmem:[%s1463_s4 + $0x10] sm:$0xff] %vm213_vm3, %v454_v1  ;;  %482 = vmatpush.msra.mxu2 %v454_v1  ;;  %511 = vmatpush.msra.mxu3 %v454_v1  ;;  %v635_v7 = vsel %vm634_vm5, %v1057_v45, %v631_v2  ;;  %v803_v9 = vmul.f32 %v1059_v22, %v798_v54  ;;  %vm808_vm7 = vweird.f32 %v1059_v22 }
 0x2c5   :  { %1060 = vrcp.f32 %v801_v24  ;;  %540 = vmatpush.msra.mxu0 %v454_v1  ;;  %970 = vmatmul.msk.f32.vlgmr.msra.gmra.mxu2 %vm213_vm3, %v454_v1  ;;  %984 = vst.msk [vmem:[%s1463_s4 + $0x20] sm:$0xff] %vm213_vm3, %v1362_v3  ;;  %v640_v10 = vsel %vm637_vm6, %v639_v5, %v635_v7  ;;  %vm809_vm9 = vmor %vm807_vm8, %vm808_vm7  ;;  %v828_v28 = vand.u32 2147483648, %v801_v24  ;;  %v826_v30 = vand.u32 2147483647, %v801_v24 }
 0x2c6   :  { %v641_v25 = vmul.f32 %v1291_v38, %v640_v10  ;;  %v804_v6 = vsub.f32 1.0, %v803_v9  ;;  %vm822_vm13 = vweird.f32 %v801_v24 }
 0x2c7   :  { %v829_v33 = vor.u32 1.1754944e-38, %v828_v28  ;;  %vm827_vm15 = vcmp.eq.f32.partialorder %v826_v30, 8.507059e+37 }
 0x2c8   :  { %v805_v12 = vmul.f32 %v1059_v22, %v804_v6  ;;  %v643_v14 = vsub.f32 %v641_v25, %v1296_v46 }
 0x2ca   :  { %v806_v17 = vadd.f32 %v1059_v22, %v805_v12  ;;  %v645_v18 = vmul.f32 %v1304_v51, %v643_v14 }
 0x2cb   :  { %v1061_v16 = vpop.eup %1060 }
 0x2cc   :  { %v818_v20 = vmul.f32 %v1061_v16, %v801_v24  ;;  %v810_v21 = vsel %vm809_vm9, %v1059_v22, %v806_v17  ;;  %985 = vst.msk [vmem:[%s1463_s4 + $0x28] sm:$0x1] %vm217_vm4, %v645_v18  ;;  %986 = vmatpush.msk.msrb.mxu2 %vm275_vm10, %v645_v18  ;;  %vm823_vm12 = vweird.f32 %v1061_v16 }
 0x2cd   :  { %v815_v38 = vsel %vm812_vm11, %v814_v19, %v810_v21  ;;  %971 = vmatmul.msk.f32.gmra.mxu2 %vm213_vm3, %v1343_v43  ;;  %vm824_vm14 = vmor %vm822_vm13, %vm823_vm12 }
 0x2ce   :  { %v819_v26 = vsub.f32 1.0, %v818_v20  ;;  %v816_v27 = vmul.f32 %v1300_v50, %v815_v38  ;;  %672 = vmatpush.msrb.mxu2 %v1362_v3 }
 0x2d0   :  { %v820_v29 = vmul.f32 %v1061_v16, %v819_v26  ;;  %v832_v31 = vsub.f32 %v816_v27, %v1326_v4 }
 0x2d2   :  { %v821_v32 = vadd.f32 %v1061_v16, %v820_v29  ;;  %v834_v34 = vmul.f32 %v1329_v8, %v832_v31 }
 0x2d4   :  { %v825_v35 = vsel %vm824_vm14, %v1061_v16, %v821_v32  ;;  %1001 = vst.msk [vmem:[%s1463_s4 + $0x30] sm:$0xff] %vm213_vm3, %v834_v34 }
 0x2d5   :  { %v830_v36 = vsel %vm827_vm15, %v829_v33, %v825_v35  ;;  %987 = vmatmul.msk.f32.vlgmr.msrb.gmra.mxu2 %vm213_vm3, %v1362_v3 }
 0x2d6   :  { %v831_v50 = vmul.f32 %v1317_v57, %v830_v36 }
 0x2d8   :  { %v833_v4 = vsub.f32 %v831_v50, %v1296_v46 }
 0x2da   :  { %v835_v37 = vmul.f32 %v1304_v51, %v833_v4 }
 0x2dc   :  { %1002 = vst.msk [vmem:[%s1463_s4 + $0x38] sm:$0x1] %vm217_vm4, %v835_v37  ;;  %1003 = vmatpush.msk.msra.mxu2 %vm275_vm10, %v835_v37 }
 0x2dd   :  { %988 = vmatmul.msk.f32.gmra.mxu2 %vm213_vm3, %v645_v18 }
 0x2de   :  { %862 = vmatpush.msra.mxu2 %v834_v34 }
 0x2e5   :  { %1004 = vmatmul.msk.f32.vlgmr.msra.gmra.mxu2 %vm213_vm3, %v834_v34 }
 0x2e8   :  { %v295_v57 = vpop.f32.mrf.mxu2 }
 0x2e9   :  { %958 = vmatmul.msk.f32.vlgmr.msrb.gmra.mxu3 %vm213_vm3, %v295_v57  ;;  %v298_v46 = vpop.f32.mrf.mxu3 }
 0x2ea   :  { %989 = vmatpush.msk.msrb.mxu3 %vm275_vm10, %v645_v18 }
 0x2ec   :  { %701 = vmatpush.msrb.mxu3 %v1362_v3 }
 0x2ed   :  { %1005 = vmatmul.msk.f32.gmra.mxu2 %vm213_vm3, %v835_v37 }
 0x2f1   :  { %959 = vmatmul.msk.f32.gmra.mxu3 %vm213_vm3, %v298_v46 }
 0x348   :  { %v484_v51 = vpop.f32.mrf.mxu2 }
 0x349   :  { %973 = vmatmul.msk.f32.vlgmr.msra.gmra.mxu3 %vm213_vm3, %v484_v51 }
 0x34a   :  { %1006 = vmatpush.msk.msra.mxu3 %vm275_vm10, %v835_v37 }
 0x34c   :  { %891 = vmatpush.msra.mxu3 %v834_v34 }
 0x350   :  { %v487_v8 = vpop.f32.mrf.mxu2 }
 0x351   :  { %974 = vmatmul.msk.f32.gmra.mxu3 %vm213_vm3, %v487_v8 }
 0x358   :  { %v674_v39 = vpop.f32.mrf.mxu2 }
 0x359   :  { %990 = vmatmul.msk.f32.vlgmr.msrb.gmra.mxu3 %vm213_vm3, %v674_v39 }
 0x360   :  { %v677_v40 = vpop.f32.mrf.mxu2 }
 0x361   :  { %991 = vmatmul.msk.f32.gmra.mxu3 %vm213_vm3, %v677_v40 }
 0x368   :  { %v864_v23 = vpop.f32.mrf.mxu2 }
 0x369   :  { %1007 = vmatmul.msk.f32.vlgmr.msra.gmra.mxu3 %vm213_vm3, %v864_v23 }
 0x36c   :  { %v324_v41 = vpop.f32.mrf.mxu3 }
 0x36d   :  { %961 = vmatmul.msk.f32.vlgmr.msrb.gmra.mxu0 %vm213_vm3, %v324_v41 }
 0x36e   :  { %992 = vmatpush.msk.msrb.mxu0 %vm275_vm10, %v645_v18 }
 0x370   :  { %730 = vmatpush.msrb.mxu0 %v1362_v3  ;;  %v867_v42 = vpop.f32.mrf.mxu2 }
 0x371   :  { %1008 = vmatmul.msk.f32.gmra.mxu3 %vm213_vm3, %v867_v42 }
 0x374   :  { %v327_v43 = vpop.f32.mrf.mxu3 }
 0x375   :  { %962 = vmatmul.msk.f32.gmra.mxu0 %vm213_vm3, %v327_v43 }
 0x3cc   :  { %v513_v15 = vpop.f32.mrf.mxu3 }
 0x3cd   :  { %976 = vmatmul.msk.f32.vlgmr.msra.gmra.mxu0 %vm213_vm3, %v513_v15 }
 0x3ce   :  { %1009 = vmatpush.msk.msra.mxu0 %vm275_vm10, %v835_v37 }
 0x3d0   :  { %920 = vmatpush.msra.mxu0 %v834_v34 }
 0x3d4   :  { %v516_v44 = vpop.f32.mrf.mxu3 }
 0x3d5   :  { %977 = vmatmul.msk.f32.gmra.mxu0 %vm213_vm3, %v516_v44 }
 0x3dc   :  { %v703_v45 = vpop.f32.mrf.mxu3 }
 0x3dd   :  { %993 = vmatmul.msk.f32.vlgmr.msrb.gmra.mxu0 %vm213_vm3, %v703_v45 }
 0x3e4   :  { %v706_v47 = vpop.f32.mrf.mxu3 }
 0x3e5   :  { %994 = vmatmul.msk.f32.gmra.mxu0 %vm213_vm3, %v706_v47 }
 0x3ea   :  { %v353_v48 = vpop.f32.mrf.mxu0 }
 0x3eb   :  { %359 = vst.msk [vmem:[%s1464_s5] sm:$0xff] %vm213_vm3, %v353_v48 }
 0x3ec   :  { %v893_v49 = vpop.f32.mrf.mxu3 }
 0x3ed   :  { %1010 = vmatmul.msk.f32.vlgmr.msra.gmra.mxu0 %vm213_vm3, %v893_v49 }
 0x3f2   :  { %v356_v52 = vpop.f32.mrf.mxu0 }
 0x3f3   :  { %360 = vst.msk [vmem:[%s1464_s5 + $0x8] sm:$0x1] %vm217_vm4, %v356_v52 }
 0x3f4   :  { %v896_v53 = vpop.f32.mrf.mxu3 }
 0x3f5   :  { %1011 = vmatmul.msk.f32.gmra.mxu0 %vm213_vm3, %v896_v53 }
 0x44a   :  { %v542_v54 = vpop.f32.mrf.mxu0 }
 0x44b   :  { %978 = vst.msk [vmem:[%s1464_s5 + $0x10] sm:$0xff] %vm213_vm3, %v542_v54 }
 0x452   :  { %v545_v56 = vpop.f32.mrf.mxu0 }
 0x453   :  { %979 = vst.msk [vmem:[%s1464_s5 + $0x18] sm:$0x1] %vm217_vm4, %v545_v56 }
 0x45a   :  { %v732_v55 = vpop.f32.mrf.mxu0 }
 0x45b   :  { %995 = vst.msk [vmem:[%s1464_s5 + $0x20] sm:$0xff] %vm213_vm3, %v732_v55 }
 0x462   :  { %v735_v58 = vpop.f32.mrf.mxu0 }
 0x463   :  { %996 = vst.msk [vmem:[%s1464_s5 + $0x28] sm:$0x1] %vm217_vm4, %v735_v58 }
 0x46a   :  { %v922_v59 = vpop.f32.mrf.mxu0 }
 0x46b   :  { %1012 = vst.msk [vmem:[%s1464_s5 + $0x30] sm:$0xff] %vm213_vm3, %v922_v59 }
 0x472   :  { %v925_v60 = vpop.f32.mrf.mxu0 }
 0x473   :  { %1013 = vst.msk [vmem:[%s1464_s5 + $0x38] sm:$0x1] %vm217_vm4, %v925_v60 }
 0x474   :  { %939 = vsyncpa [#allocation3], 1 }
 0x475   :  { %940 = vsyncpa [#allocation5], 1 }
 0x476   :  { %941 = vsyncpa [#allocation8], 1 }

</bundles_post_ra>
